<compile_context>
chip_gen: v7x
topology: tpu7x:2x2x1
jax: 0.10.0
libtpu: 0.0.40
codegen_flags: <defaults>
</compile_context>

<pallas_src>
import jax
import jax.numpy as jnp
from jax.experimental import pallas as pl
from jax.experimental.pallas import tpu as pltpu


def _mean_pool_kernel(h_ref, m_ref, o_ref, acc_ref, msum_ref):
    # h_ref: (1, TS, H)   m_ref: (1, 1, TS)   o_ref: (1, 1, H)
    # acc_ref: (1, H) f32 running masked sum; msum_ref: (1, 1) f32 token count
    k = pl.program_id(1)

    @pl.when(k == 0)
    def _init():
        acc_ref[...] = jnp.zeros_like(acc_ref)
        msum_ref[...] = jnp.zeros_like(msum_ref)

    h = h_ref[0]                         # (TS, H), native dtype -> MXU operand
    m = m_ref[0]                         # (1, TS), lane-dense mask row

    # Masked sum over this sequence tile on the MXU: (1,TS) @ (TS,H) -> (1,H),
    # accumulated in f32.
    acc_ref[...] += jnp.dot(
        m.astype(h.dtype), h, preferred_element_type=jnp.float32
    )
    # Token count for this tile (cheap lane reduce on the XLU).
    msum_ref[...] += jnp.sum(m.astype(jnp.float32), axis=-1, keepdims=True)

    @pl.when(k == pl.num_programs(1) - 1)
    def _finalize():
        denom = jnp.maximum(msum_ref[...], 1e-9)        # torch.clamp(min=1e-9)
        inv = pl.reciprocal(denom, approx=True)         # EUP slot (free-ish)
        inv = inv * (2.0 - denom * inv)                 # one Newton step -> ~f32 exact
        o_ref[0] = (acc_ref[...] * inv).astype(o_ref.dtype)


def _choose_seq_tile(S: int, H: int, itemsize: int) -> int:
    # ~4 MiB per hidden-state block => ~8-9 MiB resident with double buffering.
    # Amortizes the ~0.35us per-grid-step overhead (>=85% of HBM roofline in
    # measured tile sweeps) while staying inside the default scoped-VMEM limit
    # on v5e (16 MiB), v6e/v7x (32 MiB) and v7x's 64 MiB physical VMEM.
    # (Could query pltpu.get_tpu_info().vmem_capacity_bytes to go bigger on
    #  v5e/v6e, but this is already at the memory-bandwidth roofline.)
    target_bytes = 4 << 20
    rows = max(1, target_bytes // max(1, H * itemsize))
    if rows >= S:
        return S                         # single tile: block dims == array dims
    # Multiple of 128 keeps both the mask's lane dim (TS) and the hidden
    # state's sublane dim (TS) legal under the (8, 128) tiling constraint.
    return max(128, (rows // 128) * 128)


def mean_pooling(last_hidden_state: jax.Array, attention_masks: jax.Array) -> jax.Array:
    """last_hidden_state: (B, S, H); attention_masks: (B, S) -> (B, H) float32."""
    B, S, H = last_hidden_state.shape
    ts = _choose_seq_tile(S, H, jnp.dtype(last_hidden_state.dtype).itemsize)
    num_k = pl.cdiv(S, ts)
    s_pad = num_k * ts

    h = last_hidden_state
    m = attention_masks
    if s_pad != S:
        # Zero-pad the ragged sequence tail; zero mask contributes nothing.
        h = jnp.pad(h, ((0, 0), (0, s_pad - S), (0, 0)))
        m = jnp.pad(m, ((0, 0), (0, s_pad - S)))
    m3 = m.reshape(B, 1, s_pad)          # lane-dense mask: sequence on lanes

    out = pl.pallas_call(
        _mean_pool_kernel,
        out_shape=jax.ShapeDtypeStruct((B, 1, H), jnp.float32),
        grid_spec=pltpu.PrefetchScalarGridSpec(
            num_scalar_prefetch=0,
            grid=(B, num_k),             # batch parallel, sequence = reduction
            in_specs=[
                pl.BlockSpec((1, ts, H), lambda b, k: (b, k, 0)),
                pl.BlockSpec((1, 1, ts), lambda b, k: (b, 0, k)),
            ],
            out_specs=pl.BlockSpec((1, 1, H), lambda b, k: (b, 0, 0)),
            scratch_shapes=[
                pltpu.VMEM((1, H), jnp.float32),   # running masked sum
                pltpu.VMEM((1, 1), jnp.float32),   # running mask count
            ],
        ),
        compiler_params=pltpu.CompilerParams(
            dimension_semantics=("parallel", "arbitrary"),
        ),
    )(h, m3)
    return out.reshape(B, H)


def _reference(last_hidden_state, attention_masks):
    m = attention_masks[..., None].astype(jnp.float32)
    s = jnp.sum(last_hidden_state.astype(jnp.float32) * m, axis=1)
    d = jnp.maximum(jnp.sum(m, axis=1), 1e-9)
    return s / d


if __name__ == "__main__":
    key = jax.random.PRNGKey(0)
    k1, k2 = jax.random.split(key)

    B, S, H = 2, 8, 32
    last_hidden_state = jax.random.normal(k1, (B, S, H), dtype=jnp.float32)
    # binary attention mask (ints in torch; float-cast inside the forward)
    attention_masks = (jax.random.uniform(k2, (B, S)) > 0.3).astype(jnp.int32)

    out = mean_pooling(last_hidden_state, attention_masks)
    out = jax.block_until_ready(out)

    ref = _reference(last_hidden_state, attention_masks)
    assert out.shape == (B, H)
    assert jnp.allclose(out, ref, atol=1e-4, rtol=1e-4), "mismatch vs reference"

    print("KERNEL_OK")
</pallas_src>

<mosaic_0001>
module attributes {stable_mosaic.version = 11 : i64} {
  func.func @_mean_pool_kernel(%arg0: i32, %arg1: i32, %arg2: memref<1x8x32xf32, #tpu.memory_space<vmem>>, %arg3: memref<1x1x8xi32, #tpu.memory_space<vmem>>, %arg4: memref<1x1x32xf32, #tpu.memory_space<vmem>>, %arg5: memref<1x32xf32, #tpu.memory_space<vmem>>, %arg6: memref<1x1xf32, #tpu.memory_space<vmem>>) attributes {dimension_semantics = [#tpu.dimension_semantics<parallel>, #tpu.dimension_semantics<arbitrary>], iteration_bounds = array<i64: 2, 1>, scalar_prefetch = 0 : i64, scratch_operands = 2 : i64, tpu.core_type = #tpu.core_type<tc>, window_params = [{transform_indices = @transform_0, window_bounds = array<i64: 1, 8, 32>}, {transform_indices = @transform_1, window_bounds = array<i64: 1, 1, 8>}, {transform_indices = @transform_2, window_bounds = array<i64: 1, 1, 32>}]} {
    %c0_i32 = arith.constant 0 : i32
    %0 = arith.cmpi eq, %arg1, %c0_i32 : i32
    %1 = arith.extui %0 : i1 to i32
    %c0_i32_0 = arith.constant 0 : i32
    %2 = arith.cmpi ne, %1, %c0_i32_0 : i32
    scf.if %2 {
      %cst_17 = arith.constant 0.000000e+00 : f32
      %21 = vector.broadcast %cst_17 : f32 to vector<1x32xf32>
      %c0_18 = arith.constant 0 : index
      %c0_19 = arith.constant 0 : index
      %22 = vector.load %arg5[%c0_18, %c0_19] : memref<1x32xf32, #tpu.memory_space<vmem>>, vector<1x32xf32>
      tpu.vector_store %arg5[%c0_18, %c0_19], %21 {strides = array<i32>} : memref<1x32xf32, #tpu.memory_space<vmem>>, vector<1x32xf32>,
      %cst_20 = arith.constant 0.000000e+00 : f32
      %23 = vector.broadcast %cst_20 : f32 to vector<1x1xf32>
      %c0_21 = arith.constant 0 : index
      %c0_22 = arith.constant 0 : index
      %24 = vector.load %arg6[%c0_21, %c0_22] : memref<1x1xf32, #tpu.memory_space<vmem>>, vector<1x1xf32>
      tpu.vector_store %arg6[%c0_21, %c0_22], %23 {strides = array<i32>} : memref<1x1xf32, #tpu.memory_space<vmem>>, vector<1x1xf32>,
    } else {
    }
    %c0 = arith.constant 0 : index
    %c0_1 = arith.constant 0 : index
    %c0_2 = arith.constant 0 : index
    %3 = vector.load %arg2[%c0, %c0_1, %c0_2] : memref<1x8x32xf32, #tpu.memory_space<vmem>>, vector<1x8x32xf32>
    %4 = vector.shape_cast %3 : vector<1x8x32xf32> to vector<8x32xf32>
    %c0_3 = arith.constant 0 : index
    %c0_4 = arith.constant 0 : index
    %c0_5 = arith.constant 0 : index
    %5 = vector.load %arg3[%c0_3, %c0_4, %c0_5] : memref<1x1x8xi32, #tpu.memory_space<vmem>>, vector<1x1x8xi32>
    %6 = vector.shape_cast %5 : vector<1x1x8xi32> to vector<1x8xi32>
    %c0_6 = arith.constant 0 : index
    %c0_7 = arith.constant 0 : index
    %7 = vector.load %arg5[%c0_6, %c0_7] : memref<1x32xf32, #tpu.memory_space<vmem>>, vector<1x32xf32>
    %8 = arith.sitofp %6 : vector<1x8xi32> to vector<1x8xf32>
    %cst = arith.constant dense<0.000000e+00> : vector<1x32xf32>
    %9 = tpu.matmul %8, %4, %cst {dimension_numbers = #tpu.dot_dimension_numbers<[1], [0], [0], [1], [0, 0, 1, 1], [], []>} : vector<1x8xf32>, vector<8x32xf32>, vector<1x32xf32> -> vector<1x32xf32>
    %10 = arith.addf %7, %9 : vector<1x32xf32>
    %c0_8 = arith.constant 0 : index
    %c0_9 = arith.constant 0 : index
    %11 = vector.load %arg5[%c0_8, %c0_9] : memref<1x32xf32, #tpu.memory_space<vmem>>, vector<1x32xf32>
    tpu.vector_store %arg5[%c0_8, %c0_9], %10 {strides = array<i32>} : memref<1x32xf32, #tpu.memory_space<vmem>>, vector<1x32xf32>,
    %c0_10 = arith.constant 0 : index
    %c0_11 = arith.constant 0 : index
    %12 = vector.load %arg6[%c0_10, %c0_11] : memref<1x1xf32, #tpu.memory_space<vmem>>, vector<1x1xf32>
    %13 = arith.sitofp %6 : vector<1x8xi32> to vector<1x8xf32>
    %cst_12 = arith.constant dense<0.000000e+00> : vector<1xf32>
    %14 = vector.multi_reduction <add>, %13, %cst_12 [1] : vector<1x8xf32> to vector<1xf32>
    %15 = vector.shape_cast %14 : vector<1xf32> to vector<1x1xf32>
    %16 = arith.addf %12, %15 : vector<1x1xf32>
    %c0_13 = arith.constant 0 : index
    %c0_14 = arith.constant 0 : index
    %17 = vector.load %arg6[%c0_13, %c0_14] : memref<1x1xf32, #tpu.memory_space<vmem>>, vector<1x1xf32>
    tpu.vector_store %arg6[%c0_13, %c0_14], %16 {strides = array<i32>} : memref<1x1xf32, #tpu.memory_space<vmem>>, vector<1x1xf32>,
    %c0_i32_15 = arith.constant 0 : i32
    %18 = arith.cmpi eq, %arg1, %c0_i32_15 : i32
    %19 = arith.extui %18 : i1 to i32
    %c0_i32_16 = arith.constant 0 : i32
    %20 = arith.cmpi ne, %19, %c0_i32_16 : i32
    scf.if %20 {
      %c0_17 = arith.constant 0 : index
      %c0_18 = arith.constant 0 : index
      %21 = vector.load %arg6[%c0_17, %c0_18] : memref<1x1xf32, #tpu.memory_space<vmem>>, vector<1x1xf32>
      %cst_19 = arith.constant 9.99999971E-10 : f32
      %22 = vector.broadcast %cst_19 : f32 to vector<1x1xf32>
      %23 = arith.maximumf %21, %22 : vector<1x1xf32>
      %24 = tpu.reciprocal %23 {approx = true} : vector<1x1xf32> -> vector<1x1xf32>
      %25 = arith.mulf %23, %24 : vector<1x1xf32>
      %cst_20 = arith.constant 2.000000e+00 : f32
      %26 = vector.broadcast %cst_20 : f32 to vector<1x1xf32>
      %27 = arith.subf %26, %25 : vector<1x1xf32>
      %28 = arith.mulf %24, %27 : vector<1x1xf32>
      %c0_21 = arith.constant 0 : index
      %c0_22 = arith.constant 0 : index
      %29 = vector.load %arg5[%c0_21, %c0_22] : memref<1x32xf32, #tpu.memory_space<vmem>>, vector<1x32xf32>
      %30 = vector.broadcast %28 : vector<1x1xf32> to vector<1x32xf32>
      %31 = arith.mulf %29, %30 : vector<1x32xf32>
      %c0_23 = arith.constant 0 : index
      %c0_24 = arith.constant 0 : index
      %c0_25 = arith.constant 0 : index
      %32 = vector.load %arg4[%c0_23, %c0_24, %c0_25] : memref<1x1x32xf32, #tpu.memory_space<vmem>>, vector<1x1x32xf32>
      %33 = vector.shape_cast %32 : vector<1x1x32xf32> to vector<1x32xf32>
      %34 = vector.shape_cast %31 : vector<1x32xf32> to vector<1x1x32xf32>
      tpu.vector_store %arg4[%c0_23, %c0_24, %c0_25], %34 {strides = array<i32>} : memref<1x1x32xf32, #tpu.memory_space<vmem>>, vector<1x1x32xf32>,
    } else {
    }
    return
  }
  func.func @transform_0(%arg0: i32, %arg1: i32) -> (i32, i32, i32) {
    %c0_i32 = arith.constant 0 : i32
    %c0_i32_0 = arith.constant 0 : i32
    return %arg0, %arg1, %c0_i32 : i32, i32, i32
  }
  func.func @transform_1(%arg0: i32, %arg1: i32) -> (i32, i32, i32) {
    %c0_i32 = arith.constant 0 : i32
    %c0_i32_0 = arith.constant 0 : i32
    return %arg0, %c0_i32, %arg1 : i32, i32, i32
  }
  func.func @transform_2(%arg0: i32, %arg1: i32) -> (i32, i32, i32) {
    %c0_i32 = arith.constant 0 : i32
    %c0_i32_0 = arith.constant 0 : i32
    %c0_i32_1 = arith.constant 0 : i32
    return %arg0, %c0_i32, %c0_i32_0 : i32, i32, i32
  }
}

</mosaic_0001>

<bundles_post_ra>
// kernel: tpu_custom_call.1
= control target key start
LH: loop header
LB: loop body
LE: loop exit
PB: predicated region body
PF: predicated region fallthrough
CT: control target
= control target key end

     0   :  { %7 = vsyncpa [#allocation5], 0  ;;  %s820_s0 = inlined_call_operand.hbm [shape: f32[2,8,32], index: 0, kind: input, shape index: {}]   ;;  %s821_s1 = inlined_call_operand.vmem [shape: s32[2,1,8], index: 1, kind: input, shape index: {}]   ;;  %s822_s2 = inlined_call_operand.hbm [shape: f32[2,1,32], index: 2, kind: output, shape index: {}]  }
   0x1   :  { %9 = vsyncpa [#allocation5 + $0x1], 0 }
   0x2   :  { %10 = vsyncpa [#allocation6], 0 }
   0x3   :  { %12 = vsyncpa [#allocation6 + $0x1], 0  ;;  %s637_s9 = smov 0   ;;  %s639_s10 = smov 0  }
   0x4   :  { %s641_s11 = smov 0   ;;  %s643_s12 = smov 0  }
   0x5   :  { %s645_s13 = smov 0   ;;  %s647_s14 = smov 0  }
   0x6 LB: > { %s416_s15 = sadd.s32 4294967295, %s615_s14   ;;  %s417_s16 = sadd.s32 4294967294, %s615_s14   ;;  %s615_s14 = sphi %s647_s14, %s18_s14   ;;  %s611_s13 = sphi %s645_s13, %s838_s13   ;;  %s607_s12 = sphi %s643_s12, %s837_s12   ;;  %s603_s11 = sphi %s641_s11, %s836_s11   ;;  %s599_s10 = sphi %s639_s10, %s835_s10   ;;  %s595_s9 = sphi %s637_s9, %s834_s9  }
   0x7   : > { %s30_s17 = sadd.s32 1, %s611_s13  ;;  %s39_s18 = sadd.s32 1, %s603_s11 }
   0x8   : > { %p32_p0 = scmp.ge.s32.totalorder %s30_s17, 2  ;;  %p46_p1 = scmp.ne.s32.totalorder %s603_s11, %s599_s10 }
   0x9   : > { %p47_p2 = scmp.eq.s32.totalorder %s615_s14, 0  ;;  %p52_p3 = scmp.ne.s32.totalorder %s599_s10, %s595_s9 }
   0xa   : > { %s840_s17 = smov (%p32_p0, %s30_s17), 0  ;;  %p53_p5 = scmp.eq.s32.totalorder %s416_s15, 0 }
   0xb   : > { %p678_p4 = por %p47_p2, %p46_p1  ;;  %s34_s20 = ssub.s32 %s611_s13, %s840_s17 }
   0xc   : > { %p104_p6 = scmp.eq.s32.totalorder %s416_s15, 1  ;;  %p37_p7 = scmp.eq.s32.totalorder %s34_s20, 0 }
   0xd   : > { %p684_p8 = por %p53_p5, %p52_p3  ;;  %p110_p10 = scmp.eq.s32.totalorder %s417_s16, 1 }
   0xe   : > { %p688_p9 = por %p104_p6, %p46_p1  ;;  %p447_p13 = scmp.lt.s32.totalorder %s615_s14, 2 }
   0xf   : > { %s693_s23 = scalar_select %p37_p7, %s603_s11, %s39_s18  }
  0x10   : > { %s826_s22 = scalar_select %p688_p9, 1, 0 }
  0x11   : > { %p695_p11 = por %p110_p10, %p52_p3  ;;  %s130_s25 = sand.u32 1, %s603_s11  }
  0x12   : > { %s420_s26 = sshll.u32 %s130_s25, 3  ;;  %s421_s27 = sshll.u32 %s611_s13, 7 }
  0x13   : > { %s827_s24 = scalar_select %p695_p11, 1, 0 }
  0x14   : > { %s706_s30 = scalar_lea.hbm %s820_s0, %s421_s27  ;;  %s134_s3 = scalar_lea.vmem [#allocation4], %s420_s26 }
  0x15   : > { %s142_s4 = sshll.u32 %s134_s3, 4  ;;  %p712_p0 = pnand %p447_p13, %p678_p4  ;;  %s708_s4 = int_to_ptr.vmem [resolvable:$true] %s142_s4 }
  0x16   : > { %s131_s6 = scalar_lea.sflag [#allocation5], %s130_s25  ;;  %s503_s7 = scalar_lea.hbm %s706_s30, 128 }
  0x17   : > { %p504_p3 = scmp.ne.s32.totalorder %s706_s30, %s503_s7  ;;  %p505_p5 = pneg %p712_p0 }
  0x18   : > { %s508_s16 = scalar_lea.hbm %s820_s0, 256  ;;  %p509_p4 = scmp.lt.u32.totalorder %s706_s30, %s820_s0 }
  0x19   : > { %p506_p6 = pnand %p505_p5, %p504_p3  ;;  %p510_p10 = scmp.lt.u32.totalorder %s508_s16, %s503_s7 }
  0x1a   : > { %p512_p12 = scmp.lt.u32.totalorder %s503_s7, %s706_s30 }
  0x1b   : > { %p507_p7 = pneg %p506_p6  ;;  %p511_p13 = por %p510_p10, %p509_p4 }
  0x1d   : > { %p513_p1 = por %p512_p12, %p511_p13 }
  0x1f   : > { %p514_p2 = pnand %p513_p1, %p507_p7 }
  0x21   : > { %517 = shalt.err (!%p514_p2)
}
  0x22   : > { %s518_s20 = scalar_lea.vmem %s708_s4, 128  ;;  %s617_s25 = smov [#allocation4]  }
  0x23   : > { %p519_p3 = scmp.ne.s32.totalorder %s708_s4, %s518_s20  ;;  %s523_s26 = sshll.u32 %s617_s25, 4  ;;  %s524_s26 = int_to_ptr.vmem [resolvable:$false] %s523_s26 }
  0x24   : > { %s525_s27 = scalar_lea.vmem %s524_s26, 256  ;;  %p526_p9 = scmp.lt.s32.totalorder %s708_s4, %s524_s26 }
  0x25   : > { %p521_p6 = pnand %p519_p3, %p505_p5  ;;  %p527_p4 = scmp.lt.s32.totalorder %s525_s27, %s518_s20 }
  0x27   : > { %p522_p11 = pneg %p521_p6  ;;  %p528_p10 = por %p527_p4, %p526_p9 }
  0x29   : > { %p529_p12 = pnand %p528_p10, %p522_p11 }
  0x2b   : > { %532 = shalt.err (!%p529_p12)
}
  0x2c   : > { %442 = dma.hbm_to_vmem [thread:$0]  (!%p712_p0), %s706_s30, 128, %s708_s4, %s131_s6  }
  0x2d   : > { %p829_p1 = scmp.lt.s32.totalorder %s615_s14, 3  ;;  %p830_p2 = scmp.ge.s32.totalorder %s615_s14, 1 }
  0x2f   : > { %p157_p5 = pnand %p830_p2, %p829_p1 }
  0x30   : > { %s748_s28 = sand.u32 (!%p157_p5), 1, %s599_s10  }
  0x31   : > { %160 = sbr.rel (%p157_p5) target bundleno = 383 (0x17f), region = 28  ;;  %s423_s29 = sshll.u32 (!%p157_p5), %s748_s28, 3 }
  0x32   : > { %s163_s3 = scalar_lea.sflag (!%p157_p5), [#allocation5], %s748_s28  ;;  %s166_s7 = scalar_lea.vmem (!%p157_p5), [#allocation4], %s423_s29 }
  0x38   : > { %586 = dma.done.wait (%p684_p8), %s163_s3, 128  }
  0x39   : > { %588 = vsyncadd (%p684_p8), %s163_s3, 4294967168  ;;  %p192_p9 = scmp.lt.s32.totalorder %s607_s12, 1  ;;  %vm202_vm0 = vcmask 253952   ;;  %vm204_vm1 = vcmask 0   ;;  %v618_v0 = vmov 0.0   ;;  %vm619_vm2 = vmmov 0  }
  0x3a   : > { %203 = vst.msk [vmem:[#allocation2] sm:$0x1] %vm202_vm0, %v618_v0  ;;  %430 = vmatprep.subr.mxu0 %v618_v0  ;;  %432 = vmatprep.mubr.msk.f32.mxu0 %vm619_vm2, %v618_v0  ;;  %vm288_vm3 = vcmask 57344   ;;  %v206_v2 = vld [vmem:[%s166_s7] sm:$0xff]  ;;  %vm210_vm4 = vcmask 64512   ;;  %v620_v5 = vmov 0   ;;  %v310_v19 = vlaneseq }
  0x3b   : > { %205 = vst.msk [vmem:[#allocation3] sm:$0x1] %vm204_vm1, %v618_v0  ;;  %s193_s30 = scalar_select %p192_p9, %s607_s12, 1  ;;  %431 = vmatpush3.msra.mxu0 %v206_v2  ;;  %500 = vset.pattern.permute.xlu0 %v620_v5 }
  0x3c   : > { %v311_v20 = vshrl.u32 %v310_v19, 7  ;;  %s425_s21 = sshll.u32 %s607_s12, 4  ;;  %s191_s8 = scalar_lea.vmem [#allocation7], %s748_s28 }
  0x3d   : > { %s197_s6 = scalar_lea.vmem %s821_s1, %s193_s30  ;;  %s329_s15 = sshll.u32 %s191_s8, 4  ;;  %s772_s15 = int_to_ptr.vmem [resolvable:$true] %s329_s15 }
  0x3e   : > { %v207_v1 = vld [vmem:[%s197_s6] sm:$0x1]  ;;  %v312_v21 = vsub.s32 0, %v311_v20  ;;  %s770_s19 = scalar_lea.hbm %s822_s2, %s425_s21  ;;  %s317_s20 = scalar_lea.sflag [#allocation6], %s748_s28 }
  0x3f   : > { %v209_v3 = vcvt.s32.f32 %v207_v1  ;;  %s533_s25 = scalar_lea.vmem %s772_s15, 16  ;;  %p831_p11 = scmp.ne.s32.totalorder %s826_s22, 0 }
  0x40   : > { %p534_p8 = scmp.ne.s32.totalorder %s772_s15, %s533_s25  ;;  %s621_s12 = smov [#allocation7]  }
  0x41   : > { %v289_v4 = vsel %vm288_vm3, %v209_v3, 0.0  ;;  %433 = vmatmul.mubr.msk.f32.vlgmr.msra.gmra.mrb[0].mxu0 %vm210_vm4, %v209_v3  ;;  %v208_v15 = vld [vmem:[#allocation2] sm:$0x1]  ;;  %s537_s26 = sshll.u32 %s621_s12, 4  ;;  %s538_s26 = int_to_ptr.vmem [resolvable:$false] %s537_s26 }
  0x42   : > { %290 = vadd.xlane.f32.xlu0 %v289_v4  ;;  %v287_v6 = vld [vmem:[#allocation3] sm:$0x1]  ;;  %p535_p0 = pnand %p534_p8, %p831_p11  ;;  %s539_s27 = scalar_lea.vmem %s538_s26, 32 }
  0x43   : > { %p540_p13 = scmp.lt.s32.totalorder %s772_s15, %s538_s26  ;;  %p541_p3 = scmp.lt.s32.totalorder %s539_s27, %s533_s25 }
  0x44   : > { %p536_p7 = pneg %p535_p0 }
  0x45   : > { %p542_p6 = por %p541_p3, %p540_p13 }
  0x47   : > { %p543_p4 = pnand %p542_p6, %p536_p7 }
  0xcf   : > { %v291_v7 = vpop.xlane.xlu0 %290 }
  0xd0   : > { %v292_v8 = vadd.f32 %v291_v7, %v287_v6 }
  0xd2   : > { %294 = vst.msk [vmem:[#allocation3] sm:$0x1] %vm204_vm1, %v292_v8 }
  0xd9   : > { %v298_v9 = vld [vmem:[#allocation3] sm:$0x1] }
  0xda   : > { %v299_v10 = vmax.f32 %v298_v9, 1e-09 }
  0xdc   : > { %501 = vrcp.f32 %v299_v10 }
  0xe6   : > { %v502_v11 = vpop.eup %501 }
  0xe7   : > { %v301_v12 = vmul.f32 %v502_v11, %v299_v10 }
  0xe9   : > { %v302_v13 = vsub.f32 2.0, %v301_v12 }
  0xeb   : > { %v303_v14 = vmul.f32 %v502_v11, %v302_v13 }
  0xed   : > { %307 = vperm.xlu0 %500, %v303_v14  }
 0x114   : > { %v280_v16 = vpop.f32.mrb[0].mxu0 }
 0x115   : > { %v284_v17 = vadd.f32 %v280_v16, %v208_v15  ;;  %v434_v18 = vpop.f32.mrb[1].mxu0 }
 0x117   : > { %286 = vst.msk [vmem:[#allocation2] sm:$0x1] %vm202_vm0, %v284_v17 }
 0x11e   : > { %v304_v23 = vld [vmem:[#allocation2] sm:$0x1] }
 0x16c   : > { %v308_v22 = vpop.permute.xlu0 %307 }
 0x16d   : > { %v313_v24 = vrot.slane %v308_v22, %v312_v21 }
 0x16f   : > { %v314_v25 = vmul.f32 %v313_v24, %v304_v23 }
 0x171   : > { %315 = vst.msk [vmem:[%s191_s8] sm:$0x1] %vm202_vm0, %v314_v25 }
 0x172   : > { %546 = shalt.err (!%p543_p4)
}
 0x173   : > { %s547_s28 = scalar_lea.hbm %s770_s19, 16  ;;  %s551_s7 = scalar_lea.hbm %s822_s2, 32 }
 0x174   : > { %p548_p10 = scmp.ne.s32.totalorder %s770_s19, %s547_s28  ;;  %p552_p2 = scmp.lt.u32.totalorder %s770_s19, %s822_s2 }
 0x175   : > { %p553_p5 = scmp.lt.u32.totalorder %s551_s7, %s547_s28  ;;  %p555_p8 = scmp.lt.u32.totalorder %s547_s28, %s770_s19 }
 0x176   : > { %p549_p12 = pnand %p548_p10, %p831_p11 }
 0x177   : > { %p554_p9 = por %p553_p5, %p552_p2 }
 0x178   : > { %p550_p1 = pneg %p549_p12 }
 0x179   : > { %p556_p0 = por %p555_p8, %p554_p9 }
 0x17b   : > { %p557_p7 = pnand %p556_p0, %p550_p1 }
 0x17d   : > { %560 = shalt.err (!%p557_p7)
}
 0x17e   : > { %437 = dma.vmem_to_hbm [thread:$0]  (%p831_p11), %s772_s15, 16, %s770_s19, %s317_s20  }
 0x17f PF: > { %s341_s5 = sand.u32 1, %s595_s9   ;;  %p832_p13 = scmp.ne.s32.totalorder %s827_s24, 0 }
 0x180   : > { %p833_p3 = scmp.ge.s32.totalorder %s615_s14, 2  ;;  %s342_s6 = scalar_lea.sflag [#allocation6], %s341_s5 }
 0x182   : > { %p444_p6 = pnand %p833_p3, %p832_p13 }
 0x184   : > { %590 = dma.done.wait (!%p444_p6), %s342_s6, 16  }
 0x185   : > { %592 = vsyncadd (!%p444_p6), %s342_s6, 4294967280  ;;  %s18_s14 = sadd.s32 1, %s615_s14   ;;  %s834_s9 = smov %s599_s10 }
 0x186   : > { %p15_p4 = scmp.ge.s32.totalorder %s18_s14, 4   ;;  %s835_s10 = smov %s603_s11 }
 0x187   : > { %s836_s11 = smov %s693_s23  ;;  %s837_s12 = smov %s611_s13 }
 0x188   : > { %s838_s13 = smov %s840_s17  ;;  %17 = sbr.rel (!%p15_p4) target bundleno = 6 (0x6), region = 84 }
 0x18f   :  { %346 = vsyncpa [#allocation5], 1 }
 0x190   :  { %348 = vsyncpa [#allocation5 + $0x1], 1 }
 0x191   :  { %349 = vsyncpa [#allocation6], 1 }
 0x192   :  { %351 = vsyncpa [#allocation6 + $0x1], 1 }

</bundles_post_ra>
